<compile_context>
chip_gen: v5e
topology: v5e:2x2
jax: 0.10.0
libtpu: 0.0.40
codegen_flags: <defaults>
</compile_context>

<pallas_src>
import jax
import jax.numpy as jnp
from jax.experimental import pallas as pl
from jax.experimental.pallas import tpu as pltpu


def attention_kernel(x_ref, w_ref, b_ref, v_ref, o_ref):
    # x_ref: (bb, T, D) bf16   w_ref: (D, H) bf16   b_ref: (1, H) f32   v_ref: (H, 1) bf16
    # o_ref: (bb, T) f32
    bb, t, d = x_ref.shape

    # Single flat MXU matmul: (bb*T, D) @ (D, H), bf16 inputs, f32 accumulation.
    x2 = x_ref[...].reshape(bb * t, d)
    pre = jnp.dot(x2, w_ref[...], preferred_element_type=jnp.float32)      # (bb*T, H) f32

    # Bias + tanh in f32 (EUP handles tanh; f32 path is portable to v5e).
    energy = jnp.tanh(pre + b_ref[...])                                    # (bb*T, H) f32

    # v-weighted reduction as a second MXU matvec: (bb*T, H) @ (H, 1) -> (bb*T, 1).
    scores = jnp.dot(energy.astype(jnp.bfloat16), v_ref[...],
                     preferred_element_type=jnp.float32)                   # (bb*T, 1) f32
    scores = scores.reshape(bb, t)                                         # softmax over T (lane dim)

    # Numerically-stable softmax over the sequence dim; exact divide so rows sum to 1.
    m = jnp.max(scores, axis=1, keepdims=True)
    e = jnp.exp(scores - m)
    denom = jnp.sum(e, axis=1, keepdims=True)
    o_ref[...] = (e / denom).astype(o_ref.dtype)


def _pick_block_b(B, T, D, *, x_bytes=2, target_bytes=4 << 20):
    """Pick a batch block so the x tile is a multi-MiB DMA, multiple of 8 when possible,
    and (for v7x's 2 TensorCores) the grid has >= 2 steps when B is large enough."""
    bb = max(1, target_bytes // (T * D * x_bytes))
    if bb >= 8:
        bb = (bb // 8) * 8
    bb = min(bb, B)
    if B >= 16 and pl.cdiv(B, bb) < 2:
        bb = min(B, max(8, ((pl.cdiv(B, 2) + 7) // 8) * 8))
    return max(1, int(bb))


def attention_forward(x, w, b, v, *, block_b=None):
    """x: (B, T, D); w: (D, H) (nn.Linear weight transposed); b: (H,); v: (H,).
    Returns (B, 1, T) f32, matching F.softmax(score, dim=1).unsqueeze(1)."""
    B, T, D = x.shape
    H = w.shape[1]

    # bf16 at the pallas_call boundary: halves x HBM traffic; weights cast once (hoisted).
    x_bf = x.astype(jnp.bfloat16)
    w_bf = w.astype(jnp.bfloat16)
    v_bf = v.reshape(H, 1).astype(jnp.bfloat16)
    b2 = b.reshape(1, H).astype(jnp.float32)

    if block_b is None:
        block_b = _pick_block_b(B, T, D)
    grid = (pl.cdiv(B, block_b),)

    # VMEM budget: double-buffered bf16 x block + f32 intermediates + output (+ headroom),
    # capped at 64 MiB so it also fits a v7x TensorCore.
    x_blk = block_b * T * D * 2
    interm = block_b * T * H * 4 * 2
    out_blk = block_b * T * 4
    est = 2 * x_blk + interm + 2 * out_blk + (D * H + 2 * H) * 4
    vmem_limit = int(min(max(2 * est, 16 << 20), 64 << 20))

    out2d = pl.pallas_call(
        attention_kernel,
        out_shape=jax.ShapeDtypeStruct((B, T), jnp.float32),
        grid=grid,
        in_specs=[
            pl.BlockSpec((block_b, T, D), lambda i: (i, 0, 0)),
            pl.BlockSpec((D, H), lambda i: (0, 0)),
            pl.BlockSpec((1, H), lambda i: (0, 0)),
            pl.BlockSpec((H, 1), lambda i: (0, 0)),
        ],
        out_specs=pl.BlockSpec((block_b, T), lambda i: (i, 0)),
        compiler_params=pltpu.CompilerParams(
            dimension_semantics=("parallel",),
            vmem_limit_bytes=vmem_limit,
        ),
    )(x_bf, w_bf, b2, v_bf)

    return out2d[:, None, :]                                              # (B, 1, T)


def reference_forward(x, w, b, v):
    energy = jnp.tanh(jnp.einsum("btd,dh->bth", x, w) + b[None, None, :])
    scores = jnp.sum(v[None, None, :] * energy, axis=2)
    return jax.nn.softmax(scores, axis=1)[:, None, :]


if __name__ == "__main__":
    # Small shapes consistent with the module's forward:
    # inputs: (batch=2, seq=8, input_size=32), hidden_size=32
    B, T, D, H = 2, 8, 32, 32

    key = jax.random.PRNGKey(0)
    kx, kw, kb, kv = jax.random.split(key, 4)

    x = jax.random.normal(kx, (B, T, D), dtype=jnp.float32)

    # Deterministic parameter init mirroring nn.Linear / nn.Parameter init style.
    stdv_lin = 1.0 / jnp.sqrt(jnp.float32(D))
    w = jax.random.uniform(kw, (D, H), minval=-stdv_lin, maxval=stdv_lin,
                           dtype=jnp.float32)          # Linear weight (transposed)
    b = jax.random.uniform(kb, (H,), minval=-stdv_lin, maxval=stdv_lin,
                           dtype=jnp.float32)          # Linear bias
    stdv_v = 1.0 / jnp.sqrt(jnp.float32(H))
    v = jax.random.uniform(kv, (H,), minval=-stdv_v, maxval=stdv_v,
                           dtype=jnp.float32)          # v parameter

    out = attention_forward(x, w, b, v)
    out = jax.block_until_ready(out)

    ref = reference_forward(x, w, b, v)
    assert out.shape == (B, 1, T)
    # bf16 inputs to the MXU (f32 accumulation) -> relaxed tolerance vs the f32 reference.
    assert jnp.allclose(out, ref, atol=2e-2, rtol=2e-2), float(jnp.max(jnp.abs(out - ref)))
    # exact f32 divide -> softmax rows sum to 1 to f32 precision.
    assert jnp.allclose(jnp.sum(out, axis=2), 1.0, atol=1e-3)

    print("KERNEL_OK")
</pallas_src>

<mosaic_0001>
module attributes {stable_mosaic.version = 11 : i64} {
  func.func @attention_kernel(%arg0: i32, %arg1: memref<2x8x32xbf16, #tpu.memory_space<vmem>>, %arg2: memref<32x32xbf16, #tpu.memory_space<vmem>>, %arg3: memref<1x32xf32, #tpu.memory_space<vmem>>, %arg4: memref<32x1xbf16, #tpu.memory_space<vmem>>, %arg5: memref<2x8xf32, #tpu.memory_space<vmem>>) attributes {dimension_semantics = [#tpu.dimension_semantics<parallel>], iteration_bounds = array<i64: 1>, scalar_prefetch = 0 : i64, scratch_operands = 0 : i64, tpu.core_type = #tpu.core_type<tc>, window_params = [{transform_indices = @transform_0, window_bounds = array<i64: 2, 8, 32>}, {pipeline_mode = #tpu.pipeline_mode<synchronous>, transform_indices = @transform_1, window_bounds = array<i64: 32, 32>}, {pipeline_mode = #tpu.pipeline_mode<synchronous>, transform_indices = @transform_2, window_bounds = array<i64: 1, 32>}, {pipeline_mode = #tpu.pipeline_mode<synchronous>, transform_indices = @transform_3, window_bounds = array<i64: 32, 1>}, {transform_indices = @transform_4, window_bounds = array<i64: 2, 8>}]} {
    %c0 = arith.constant 0 : index
    %c0_0 = arith.constant 0 : index
    %c0_1 = arith.constant 0 : index
    %0 = vector.load %arg1[%c0, %c0_0, %c0_1] : memref<2x8x32xbf16, #tpu.memory_space<vmem>>, vector<2x8x32xbf16>
    %1 = vector.shape_cast %0 : vector<2x8x32xbf16> to vector<16x32xbf16>
    %c0_2 = arith.constant 0 : index
    %c0_3 = arith.constant 0 : index
    %2 = vector.load %arg2[%c0_2, %c0_3] : memref<32x32xbf16, #tpu.memory_space<vmem>>, vector<32x32xbf16>
    %cst = arith.constant dense<0.000000e+00> : vector<16x32xf32>
    %3 = tpu.matmul %1, %2, %cst {dimension_numbers = #tpu.dot_dimension_numbers<[1], [0], [0], [1], [0, 0, 1, 1], [], []>} : vector<16x32xbf16>, vector<32x32xbf16>, vector<16x32xf32> -> vector<16x32xf32>
    %c0_4 = arith.constant 0 : index
    %c0_5 = arith.constant 0 : index
    %4 = vector.load %arg3[%c0_4, %c0_5] : memref<1x32xf32, #tpu.memory_space<vmem>>, vector<1x32xf32>
    %5 = vector.broadcast %4 : vector<1x32xf32> to vector<16x32xf32>
    %6 = arith.addf %3, %5 : vector<16x32xf32>
    %7 = math.tanh %6 : vector<16x32xf32>
    %8 = arith.truncf %7 : vector<16x32xf32> to vector<16x32xbf16>
    %c0_6 = arith.constant 0 : index
    %c0_7 = arith.constant 0 : index
    %9 = vector.load %arg4[%c0_6, %c0_7] : memref<32x1xbf16, #tpu.memory_space<vmem>>, vector<32x1xbf16>
    %cst_8 = arith.constant dense<0.000000e+00> : vector<16x1xf32>
    %10 = tpu.matmul %8, %9, %cst_8 {dimension_numbers = #tpu.dot_dimension_numbers<[1], [0], [0], [1], [0, 0, 1, 1], [], []>} : vector<16x32xbf16>, vector<32x1xbf16>, vector<16x1xf32> -> vector<16x1xf32>
    %11 = vector.shape_cast %10 : vector<16x1xf32> to vector<2x8xf32>
    %cst_9 = arith.constant dense<0xFF800000> : vector<2xf32>
    %12 = vector.multi_reduction <maximumf>, %11, %cst_9 [1] : vector<2x8xf32> to vector<2xf32>
    %13 = vector.shape_cast %12 : vector<2xf32> to vector<2x1xf32>
    %14 = vector.broadcast %13 : vector<2x1xf32> to vector<2x8xf32>
    %15 = arith.subf %11, %14 : vector<2x8xf32>
    %16 = math.exp %15 : vector<2x8xf32>
    %cst_10 = arith.constant dense<0.000000e+00> : vector<2xf32>
    %17 = vector.multi_reduction <add>, %16, %cst_10 [1] : vector<2x8xf32> to vector<2xf32>
    %18 = vector.shape_cast %17 : vector<2xf32> to vector<2x1xf32>
    %19 = vector.broadcast %18 : vector<2x1xf32> to vector<2x8xf32>
    %20 = arith.divf %16, %19 : vector<2x8xf32>
    %c0_11 = arith.constant 0 : index
    %c0_12 = arith.constant 0 : index
    %21 = vector.load %arg5[%c0_11, %c0_12] : memref<2x8xf32, #tpu.memory_space<vmem>>, vector<2x8xf32>
    tpu.vector_store %arg5[%c0_11, %c0_12], %20 {strides = array<i32>} : memref<2x8xf32, #tpu.memory_space<vmem>>, vector<2x8xf32>,
    return
  }
  func.func @transform_0(%arg0: i32) -> (i32, i32, i32) {
    %c0_i32 = arith.constant 0 : i32
    %c0_i32_0 = arith.constant 0 : i32
    %c0_i32_1 = arith.constant 0 : i32
    return %arg0, %c0_i32, %c0_i32_0 : i32, i32, i32
  }
  func.func @transform_1(%arg0: i32) -> (i32, i32) {
    %c0_i32 = arith.constant 0 : i32
    %c0_i32_0 = arith.constant 0 : i32
    %c0_i32_1 = arith.constant 0 : i32
    return %c0_i32, %c0_i32_0 : i32, i32
  }
  func.func @transform_2(%arg0: i32) -> (i32, i32) {
    %c0_i32 = arith.constant 0 : i32
    %c0_i32_0 = arith.constant 0 : i32
    %c0_i32_1 = arith.constant 0 : i32
    return %c0_i32, %c0_i32_0 : i32, i32
  }
  func.func @transform_3(%arg0: i32) -> (i32, i32) {
    %c0_i32 = arith.constant 0 : i32
    %c0_i32_0 = arith.constant 0 : i32
    %c0_i32_1 = arith.constant 0 : i32
    return %c0_i32, %c0_i32_0 : i32, i32
  }
  func.func @transform_4(%arg0: i32) -> (i32, i32) {
    %c0_i32 = arith.constant 0 : i32
    %c0_i32_0 = arith.constant 0 : i32
    return %arg0, %c0_i32 : i32, i32
  }
}

</mosaic_0001>

<bundles_post_ra>
// kernel: tpu_custom_call.1
= control target key start
LH: loop header
LB: loop body
LE: loop exit
PB: predicated region body
PF: predicated region fallthrough
CT: control target
= control target key end

     0   :  { %9 = vsyncpa [#allocation3], 0  ;;  %s393_s0 = inlined_call_operand.hbm [shape: bf16[2,8,32], index: 0, kind: input, shape index: {}]   ;;  %s394_s1 = inlined_call_operand.vmem [shape: bf16[32,32], index: 1, kind: input, shape index: {}]   ;;  %s395_s2 = inlined_call_operand.vmem [shape: f32[1,32], index: 2, kind: input, shape index: {}]   ;;  %s396_s3 = inlined_call_operand.vmem [shape: bf16[32,1], index: 3, kind: input, shape index: {}]   ;;  %s397_s4 = inlined_call_operand.hbm [shape: f32[2,8], index: 4, kind: output, shape index: {}]  }
   0x1   :  { %10 = vsyncpa [#allocation4], 0  ;;  %s15_s17 = sshll.u32 %s393_s0, 4  ;;  %s326_s18 = smov [#allocation2]   ;;  %s16_s17 = int_to_ptr.hbm [resolvable:$true] %s15_s17 }
   0x2   :  { %s17_s19 = sshll.u32 %s326_s18, 4  ;;  %s327_s20 = smov 64   ;;  %s18_s19 = int_to_ptr.vmem [resolvable:$true] %s17_s19 }
   0x3   :  { %s328_s21 = smov 4  }
   0x4   :  { %23 = dma.hbm_to_vmem [thread:$0]  %s16_s17, 128, %s18_s19, [#allocation3], %s327_s20, %s327_s20, %s328_s21  }
   0x5   :  { %322 = dma.done.wait [#allocation3], 128  }
   0x6   :  { %323 = vsyncadd [#allocation3], 4294967168  ;;  %v250_v0 = vld [vmem:[%s394_s1 + $0x8] sm:$0xff]  ;;  %v249_v1 = vld [vmem:[%s394_s1] sm:$0xff]  ;;  %vm62_vm0 = vcmask 261120   ;;  %v329_v5 = vmov 0   ;;  %v124_v17 = vlaneseq }
   0x7   :  { %72 = vmatpush.bf16.msra.mxu0 %v250_v0  ;;  %v248_v2 = vld [vmem:[#allocation2] sm:$0xff]  ;;  %v252_v3 = vld [vmem:[%s396_s3 + $0x8] sm:$0xff]  ;;  %258 = vset.pattern.permute.xlu0 %v329_v5  ;;  %vm128_vm1 = vcmask 1041409   ;;  %vm131_vm2 = vcmask 58368   ;;  %s216_s6 = sshll.u32 %s397_s4, 4  ;;  %s217_s6 = int_to_ptr.hbm [resolvable:$true] %s216_s6 }
   0x8   :  { %108 = vmatpush.bf16.msra.mxu1 %v252_v3  ;;  %v251_v4 = vld [vmem:[%s396_s3] sm:$0xff]  ;;  %260 = vset.pattern.permute.xlu2 %v329_v5  ;;  %v376_v18 = vand.u32 127, %v124_v17 }
   0x9   :  { %259 = vset.pattern.permute.xlu1 %v329_v5  ;;  %v261_v7 = vld [vmem:[%s395_s2] ss:$0 sm:$0xff]  ;;  %s330_s2 = smov [#allocation5]  }
   0xa   :  { %s214_s3 = sshll.u32 %s330_s2, 4  ;;  %s215_s3 = int_to_ptr.vmem [resolvable:$true] %s214_s3 }
   0xb   :  { %73 = vmatpush.bf16.msra.mxu0 %v249_v1 }
   0xc   :  { %109 = vmatpush.bf16.msra.mxu1 %v251_v4 }
   0xe   :  { %238 = vmatmul.msk.bf16.vlgmr.msra.gmra.mxu0 %vm62_vm0, %v248_v2 }
  0x8b   :  { %v75_v6 = vpop.f32.mrf.mxu0 }
  0x8c   :  { %v76_v8 = vadd.f32 %v261_v7, %v75_v6 }
  0x8e   :  { %262 = vtanh.f32 %v76_v8 }
  0x93   :  { %v77_v9 = vpop.f32.mrf.mxu0 }
  0x94   :  { %v78_v10 = vadd.f32 %v261_v7, %v77_v9  ;;  %v263_v11 = vpop.eup %262 }
  0x96   :  { %264 = vtanh.f32 %v78_v10 }
  0x9c   :  { %v265_v12 = vpop.eup %264 }
  0x9d   :  { %v82_v13 = vpack.c.bf16 %v265_v12, %v263_v11 }
  0x9f   :  { %247 = vmatmul.msk.bf16.vlgmr.msra.gmra.mxu1 %vm62_vm0, %v82_v13 }
 0x11c   :  { %v111_v14 = vpop.f32.mrf.mxu1 }
 0x11d   :  { %119 = vperm.xlu0 %258, %v111_v14  }
 0x124   :  { %v113_v15 = vpop.f32.mrf.mxu1 }
 0x125   :  { %122 = vperm.xlu0 %258, %v113_v15  }
 0x18f   :  { %v120_v16 = vpop.permute.xlu0 %119 }
 0x190   :  { %v126_v20 = vperm.slane %v120_v16, %v376_v18 }
 0x197   :  { %v123_v19 = vpop.permute.xlu0 %122 }
 0x198   :  { %v127_v21 = vperm.slane %v123_v19, %v376_v18 }
 0x19a   :  { %v129_v22 = vsel %vm128_vm1, %v127_v21, %v126_v20 }
 0x19b   :  { %v132_v23 = vsel %vm131_vm2, %v129_v22, -inf }
 0x19c   :  { %133 = vmax.xlane.f32.xlu1 %v132_v23 }
 0x20f   :  { %v134_v24 = vpop.xlane.xlu1 %133 }
 0x210   :  { %v136_v25 = vperm.slane %v134_v24, 0  ;;  %v137_v26 = vperm.slane %v134_v24, 1 }
 0x212   :  { %v140_v27 = vsub.f32 %v111_v14, %v136_v25  ;;  %v141_v28 = vsub.f32 %v113_v15, %v137_v26 }
 0x214   :  { %v142_v29 = vmul.f32 1.442695, %v140_v27  ;;  %v144_v30 = vmul.f32 1.442695, %v141_v28 }
 0x216   :  { %266 = vpow2.f32 %v142_v29 }
 0x217   :  { %268 = vpow2.f32 %v144_v30 }
 0x21c   :  { %v267_v31 = vpop.eup %266 }
 0x21d   :  { %v269_v32 = vpop.eup %268  ;;  %149 = vperm.xlu1 %259, %v267_v31  }
 0x21e   :  { %152 = vperm.xlu2 %260, %v269_v32  }
 0x278   :  { %v153_v33 = vpop.permute.xlu2 %152 }
 0x279   :  { %v155_v35 = vperm.slane %v153_v33, %v376_v18 }
 0x28f   :  { %v150_v34 = vpop.permute.xlu1 %149 }
 0x290   :  { %v154_v36 = vperm.slane %v150_v34, %v376_v18 }
 0x292   :  { %v156_v37 = vsel %vm128_vm1, %v155_v35, %v154_v36 }
 0x293   :  { %v158_v38 = vsel %vm131_vm2, %v156_v37, 0.0 }
 0x294   :  { %159 = vadd.xlane.f32.xlu2 %v158_v38 }
 0x307   :  { %v160_v39 = vpop.xlane.xlu2 %159 }
 0x308   :  { %v162_v40 = vperm.slane %v160_v39, 0  ;;  %v163_v41 = vperm.slane %v160_v39, 1 }
 0x30a   :  { %270 = vrcp.f32 %v162_v40  ;;  %v177_v48 = vand.u32 2147483648, %v162_v40  ;;  %v175_v50 = vand.u32 2147483647, %v162_v40  ;;  %vm171_vm4 = vweird.f32 %v162_v40 }
 0x30b   :  { %272 = vrcp.f32 %v163_v41  ;;  %v192_v57 = vand.u32 2147483648, %v163_v41  ;;  %vm186_vm8 = vweird.f32 %v163_v41  ;;  %v190_v59 = vand.u32 2147483647, %v163_v41 }
 0x30c   :  { %v178_v53 = vor.u32 1.1754944e-38, %v177_v48  ;;  %vm176_vm6 = vcmp.eq.f32.partialorder %v175_v50, 8.507059e+37 }
 0x30d   :  { %v193_v61 = vor.u32 1.1754944e-38, %v192_v57  ;;  %vm191_vm10 = vcmp.eq.f32.partialorder %v190_v59, 8.507059e+37 }
 0x310   :  { %v271_v42 = vpop.eup %270 }
 0x311   :  { %v273_v43 = vpop.eup %272  ;;  %v167_v44 = vmul.f32 %v271_v42, %v162_v40  ;;  %vm172_vm3 = vweird.f32 %v271_v42 }
 0x312   :  { %v182_v45 = vmul.f32 %v273_v43, %v163_v41  ;;  %vm173_vm5 = vmor %vm171_vm4, %vm172_vm3  ;;  %vm187_vm7 = vweird.f32 %v273_v43 }
 0x313   :  { %v168_v46 = vsub.f32 1.0, %v167_v44  ;;  %vm188_vm9 = vmor %vm186_vm8, %vm187_vm7 }
 0x314   :  { %v183_v47 = vsub.f32 1.0, %v182_v45 }
 0x315   :  { %v169_v49 = vmul.f32 %v271_v42, %v168_v46 }
 0x316   :  { %v184_v51 = vmul.f32 %v273_v43, %v183_v47 }
 0x317   :  { %v170_v52 = vadd.f32 %v271_v42, %v169_v49 }
 0x318   :  { %v185_v55 = vadd.f32 %v273_v43, %v184_v51 }
 0x319   :  { %v174_v54 = vsel %vm173_vm5, %v271_v42, %v170_v52 }
 0x31a   :  { %v179_v56 = vsel %vm176_vm6, %v178_v53, %v174_v54  ;;  %v189_v60 = vsel %vm188_vm9, %v273_v43, %v185_v55 }
 0x31b   :  { %v180_v58 = vmul.f32 %v267_v31, %v179_v56  ;;  %v194_v62 = vsel %vm191_vm10, %v193_v61, %v189_v60 }
 0x31c   :  { %v195_v63 = vmul.f32 %v269_v32, %v194_v62 }
 0x31d   :  { %199 = vperm.xlu0 %258, %v180_v58  }
 0x325   :  { %202 = vperm.xlu0 %258, %v195_v63  }
 0x38f   :  { %v200_v0 = vpop.permute.xlu0 %199 }
 0x390   :  { %v204_v2 = vperm.slane %v200_v0, %v376_v18 }
 0x397   :  { %v203_v1 = vpop.permute.xlu0 %202 }
 0x398   :  { %v205_v3 = vperm.slane %v203_v1, %v376_v18 }
 0x39a   :  { %v206_v4 = vsel %vm128_vm1, %v205_v3, %v204_v2 }
 0x39b   :  { %208 = vst.msk [vmem:[#allocation5] sm:$0x3] %vm131_vm2, %v206_v4 }
 0x39c   :  { %219 = dma.vmem_to_hbm [thread:$0]  %s215_s3, 32, %s217_s6, [#allocation4]  }
 0x39d   :  { %324 = dma.done.wait [#allocation4], 32  }
 0x39e   :  { %325 = vsyncadd [#allocation4], 4294967264 }
 0x39f   :  { %224 = vsyncpa [#allocation3], 1 }
 0x3a0   :  { %225 = vsyncpa [#allocation4], 1 }

</bundles_post_ra>
